<compile_context>
chip_gen: v7x
topology: tpu7x:2x2x1
jax: 0.10.0
libtpu: 0.0.40
codegen_flags: <defaults>
</compile_context>

<pallas_src>
import functools

import jax
import jax.numpy as jnp
from jax import lax
from jax.experimental import pallas as pl
from jax.experimental.pallas import tpu as pltpu

BN_EPS = 1e-5        # torch.nn.BatchNorm1d default eps
LN_EPS = 1e-5        # torch.nn.LayerNorm default eps
CLIP_MAGNITUDE = 3.0

_VMEM_BUDGET_BYTES = 32 << 20   # conservative across v5e / v6e / v7x


def _signed_log1p(x):
  """where(isfinite(x), sign(x) * log1p(|x|), 0) via bit-level abs/copysign.

  NaN / -inf inputs produce -0.0 instead of +0.0 (numerically equivalent).
  """
  bits = pltpu.bitcast(x, jnp.int32)
  sign = bits & jnp.int32(-0x80000000)
  a = pltpu.bitcast(bits & jnp.int32(0x7FFFFFFF), jnp.float32)
  a = jnp.where(a < jnp.inf, a, 0.0)          # zaps +/-inf and NaN (compare False)
  l = jnp.log1p(a)                            # EUP
  return pltpu.bitcast(pltpu.bitcast(l, jnp.int32) | sign, jnp.float32)


# --------------------------- pass 1: BN statistics ---------------------------
def _bn_stats_kernel(cont_ref, bn_g_ref, bn_b_ref,
                     scale_ref, shift_ref,
                     sum_sc, sumsq_sc,
                     *, total_b: int, tile_b: int, inv_b: float):
  i = pl.program_id(0)

  @pl.when(i == 0)
  def _():
    sum_sc[...] = jnp.zeros_like(sum_sc)
    sumsq_sc[...] = jnp.zeros_like(sumsq_sc)

  x = _signed_log1p(cont_ref[...])

  if total_b % tile_b != 0:
    # Mask out-of-range rows of the final (partial) batch tile so they do not
    # contaminate the global batch statistics.
    rows_left = total_b - i * tile_b
    row_id = lax.broadcasted_iota(jnp.int32, (tile_b, 1), 0)
    x = jnp.where(row_id < rows_left, x, 0.0)

  if tile_b % 8 == 0:
    # Per-sublane partial sums: each tile contributes pure vreg adds; the one
    # cross-sublane (XLU) reduce happens only once, in the epilogue below.
    xr = x.reshape(tile_b // 8, 8, x.shape[-1])
    sum_sc[...] += jnp.sum(xr, axis=0)
    sumsq_sc[...] += jnp.sum(xr * xr, axis=0)
  else:
    # Tiny-batch fallback (single block smaller than one sublane tile).
    sum_sc[0:1, :] += jnp.sum(x, axis=0, keepdims=True)
    sumsq_sc[0:1, :] += jnp.sum(x * x, axis=0, keepdims=True)

  @pl.when(i == pl.num_programs(0) - 1)
  def _():
    s = jnp.sum(sum_sc[...], axis=0, keepdims=True)
    ss = jnp.sum(sumsq_sc[...], axis=0, keepdims=True)
    mean = s * inv_b
    var = jnp.maximum(ss * inv_b - mean * mean, 0.0)
    scale = bn_g_ref[...] * lax.rsqrt(var + BN_EPS)   # fold BN into scale/shift
    scale_ref[...] = scale
    shift_ref[...] = bn_b_ref[...] - mean * scale


# ------------------- pass 2: BN apply + clamp + LayerNorm --------------------
def _normalize_kernel(cont_ref, bin_ref, scale_ref, shift_ref,
                      ln_gc_ref, ln_gb_ref, ln_bc_ref, ln_bb_ref,
                      out_ref, *, inv_d: float, num_cont: int):
  xc = _signed_log1p(cont_ref[...])
  xc = xc * scale_ref[...] + shift_ref[...]             # folded BatchNorm
  xc = jnp.clip(xc, -CLIP_MAGNITUDE, CLIP_MAGNITUDE)    # Clamp
  xb = bin_ref[...].astype(jnp.float32)                 # binary half (any dtype)

  # LayerNorm stats over the (virtual) concat of both halves — no concatenate.
  row_sum = (jnp.sum(xc, axis=-1, keepdims=True) +
             jnp.sum(xb, axis=-1, keepdims=True))
  row_sumsq = (jnp.sum(xc * xc, axis=-1, keepdims=True) +
               jnp.sum(xb * xb, axis=-1, keepdims=True))
  mu = row_sum * inv_d
  var = jnp.maximum(row_sumsq * inv_d - mu * mu, 0.0)
  r = lax.rsqrt(var + LN_EPS)                           # [TB, 1]

  # Two slab stores; lane-dense whenever num_cont is a multiple of 128,
  # otherwise Mosaic emits masked stores — still cheaper than a wrapper-side
  # pad + concatenate pass over the whole output.
  out_ref[:, :num_cont] = (((xc - mu) * r) * ln_gc_ref[...]
                           + ln_bc_ref[...]).astype(out_ref.dtype)
  out_ref[:, num_cont:] = (((xb - mu) * r) * ln_gb_ref[...]
                           + ln_bb_ref[...]).astype(out_ref.dtype)


def _pick_tile_b(batch: int, row_bytes: int) -> int:
  """Largest batch tile whose double-buffered working set fits the budget."""
  budget_rows = int((_VMEM_BUDGET_BYTES * 0.6) // (2 * max(row_bytes, 1)))
  max_rows = min(max(budget_rows, 32), 1024)
  if batch <= max_rows:
    return batch                                  # single full-dim block: always legal
  return max(32, (max_rows // 32) * 32)           # multiple of 32: f32/bf16/int8 safe


@functools.partial(jax.jit, static_argnames=("out_dtype", "tile_b"))
def double_norm_log(continuous, binary, bn_gamma, bn_beta, ln_gamma, ln_beta,
                    *, out_dtype=jnp.bfloat16, tile_b=None):
  """DoubleNormLog forward.

  continuous: [B, Cc] float, binary: [B, Cb] any real dtype (f32/bf16/int8).
  Returns [B, Cc + Cb] in `out_dtype` (bf16 default; use jnp.float32 for
  bit-level parity with the torch module's dtype).
  """
  B, Cc = continuous.shape
  Bb, Cb = binary.shape
  assert Bb == B
  D = Cc + Cb
  f32 = jnp.float32

  cont = continuous.astype(f32)
  bn_g = bn_gamma.astype(f32).reshape(1, Cc)
  bn_b = bn_beta.astype(f32).reshape(1, Cc)
  ln_g = ln_gamma.astype(f32)
  ln_b = ln_beta.astype(f32)
  ln_gc = ln_g[:Cc].reshape(1, Cc)
  ln_gb = ln_g[Cc:].reshape(1, Cb)
  ln_bc = ln_b[:Cc].reshape(1, Cc)
  ln_bb = ln_b[Cc:].reshape(1, Cb)

  bin_bytes = binary.dtype.itemsize
  out_bytes = jnp.dtype(out_dtype).itemsize
  row_bytes = Cc * 4 + Cb * bin_bytes + D * out_bytes

  if tile_b is None:
    TB = _pick_tile_b(B, row_bytes)
  else:
    TB = B if int(tile_b) >= B else max(32, (int(tile_b) // 32) * 32)
  nbt = pl.cdiv(B, TB)

  # Explicit VMEM limits sized from the double-buffered working set + headroom
  # (v5e scoped default is only 16 MiB; v7x physical is 64 MiB, so cap at 48).
  params_bytes = 2 * 4 * (6 * Cc + 2 * Cb)
  stats_vmem = 2 * TB * Cc * 4 + params_bytes + 2 * 8 * Cc * 4 + (4 << 20)
  norm_vmem = 2 * TB * row_bytes + params_bytes + (4 << 20)
  stats_vmem = int(min(max(stats_vmem, 16 << 20), 48 << 20))
  norm_vmem = int(min(max(norm_vmem, 16 << 20), 48 << 20))

  # -------- pass 1: global BatchNorm batch stats -> folded scale/shift -------
  scale, shift = pl.pallas_call(
      functools.partial(_bn_stats_kernel, total_b=B, tile_b=TB, inv_b=1.0 / B),
      out_shape=(jax.ShapeDtypeStruct((1, Cc), f32),
                 jax.ShapeDtypeStruct((1, Cc), f32)),
      grid_spec=pltpu.PrefetchScalarGridSpec(
          num_scalar_prefetch=0,
          grid=(nbt,),
          in_specs=[pl.BlockSpec((TB, Cc), lambda i: (i, 0)),
                    pl.BlockSpec((1, Cc), lambda i: (0, 0)),    # bn_gamma
                    pl.BlockSpec((1, Cc), lambda i: (0, 0))],   # bn_beta
          out_specs=[pl.BlockSpec((1, Cc), lambda i: (0, 0)),   # scale
                     pl.BlockSpec((1, Cc), lambda i: (0, 0))],  # shift
          scratch_shapes=[pltpu.VMEM((8, Cc), f32),
                          pltpu.VMEM((8, Cc), f32)]),
      compiler_params=pltpu.CompilerParams(
          dimension_semantics=("arbitrary",),       # accumulates across tiles
          vmem_limit_bytes=stats_vmem),
  )(cont, bn_g, bn_b)

  # -------- pass 2: folded BN + clamp + LayerNorm (batch tiles independent) --
  out = pl.pallas_call(
      functools.partial(_normalize_kernel, inv_d=1.0 / D, num_cont=Cc),
      out_shape=jax.ShapeDtypeStruct((B, D), out_dtype),
      grid_spec=pltpu.PrefetchScalarGridSpec(
          num_scalar_prefetch=0,
          grid=(nbt,),
          in_specs=[pl.BlockSpec((TB, Cc), lambda i: (i, 0)),   # continuous
                    pl.BlockSpec((TB, Cb), lambda i: (i, 0)),   # binary
                    pl.BlockSpec((1, Cc), lambda i: (0, 0)),    # bn scale
                    pl.BlockSpec((1, Cc), lambda i: (0, 0)),    # bn shift
                    pl.BlockSpec((1, Cc), lambda i: (0, 0)),    # ln_gamma (cont)
                    pl.BlockSpec((1, Cb), lambda i: (0, 0)),    # ln_gamma (bin)
                    pl.BlockSpec((1, Cc), lambda i: (0, 0)),    # ln_beta (cont)
                    pl.BlockSpec((1, Cb), lambda i: (0, 0))],   # ln_beta (bin)
          out_specs=pl.BlockSpec((TB, D), lambda i: (i, 0))),
      compiler_params=pltpu.CompilerParams(
          dimension_semantics=("parallel",),        # split across TCs on v7x
          vmem_limit_bytes=norm_vmem),
  )(cont, binary, scale, shift, ln_gc, ln_gb, ln_bc, ln_bb)
  return out


def _reference(continuous, binary, bn_gamma, bn_beta, ln_gamma, ln_beta):
  """Pure-JAX reference mirroring the PyTorch module's forward."""
  x = jnp.where(jnp.isfinite(continuous), continuous, 0.0)
  x = jnp.sign(x) * jnp.log1p(jnp.abs(x))
  mean = jnp.mean(x, axis=0, keepdims=True)
  var = jnp.mean((x - mean) ** 2, axis=0, keepdims=True)
  x = (x - mean) / jnp.sqrt(var + BN_EPS) * bn_gamma.reshape(1, -1) \
      + bn_beta.reshape(1, -1)
  x = jnp.clip(x, -CLIP_MAGNITUDE, CLIP_MAGNITUDE)
  y = jnp.concatenate([x, binary.astype(jnp.float32)], axis=1)
  mu = jnp.mean(y, axis=-1, keepdims=True)
  v = jnp.mean((y - mu) ** 2, axis=-1, keepdims=True)
  return (y - mu) / jnp.sqrt(v + LN_EPS) * ln_gamma.reshape(1, -1) \
      + ln_beta.reshape(1, -1)


if __name__ == "__main__":
  def run_case(B, Cc, Cb, tile_b, out_dtype, bin_dtype, seed, atol, rtol):
    key = jax.random.fold_in(jax.random.PRNGKey(0), seed)
    k0, k1, k2, k3, k4, k5 = jax.random.split(key, 6)

    continuous = 10.0 * jax.random.normal(k0, (B, Cc), dtype=jnp.float32)
    # exercise InputNonFinite
    continuous = continuous.at[0, 1].set(jnp.inf)
    continuous = continuous.at[1, min(2, Cc - 1)].set(-jnp.inf)
    continuous = continuous.at[min(2, B - 1), 0].set(jnp.nan)

    # binary features are 0/1; any real dtype is accepted (cast in-kernel).
    binary = (jax.random.uniform(k1, (B, Cb)) > 0.5).astype(bin_dtype)

    bn_gamma = 1.0 + 0.1 * jax.random.normal(k2, (Cc,), dtype=jnp.float32)
    bn_beta = 0.1 * jax.random.normal(k3, (Cc,), dtype=jnp.float32)
    ln_gamma = 1.0 + 0.1 * jax.random.normal(k4, (Cc + Cb,), dtype=jnp.float32)
    ln_beta = 0.1 * jax.random.normal(k5, (Cc + Cb,), dtype=jnp.float32)

    out = double_norm_log(continuous, binary, bn_gamma, bn_beta,
                          ln_gamma, ln_beta, out_dtype=out_dtype, tile_b=tile_b)
    out = jax.block_until_ready(out)

    ref = _reference(continuous, binary, bn_gamma, bn_beta, ln_gamma, ln_beta)
    assert out.shape == (B, Cc + Cb) and out.dtype == out_dtype
    err = float(jnp.max(jnp.abs(out.astype(jnp.float32) - ref)))
    assert jnp.allclose(out.astype(jnp.float32), ref, atol=atol, rtol=rtol), \
        f"max abs err {err}"

  # Aligned shapes, multiple batch tiles, int8 binary, f32 output.
  run_case(B=64, Cc=128, Cb=128, tile_b=32, out_dtype=jnp.float32,
           bin_dtype=jnp.int8, seed=0, atol=1e-3, rtol=1e-3)
  # Ragged features + partial last batch tile, bf16 binary, bf16 output
  # (exercises the no-pad / boundary-masking / unaligned-slab-store path).
  run_case(B=40, Cc=72, Cb=40, tile_b=32, out_dtype=jnp.bfloat16,
           bin_dtype=jnp.bfloat16, seed=1, atol=4e-2, rtol=2e-2)
  # Tiny single-block case (batch smaller than a sublane tile), f32 binary.
  run_case(B=6, Cc=5, Cb=3, tile_b=None, out_dtype=jnp.float32,
           bin_dtype=jnp.float32, seed=2, atol=1e-3, rtol=1e-3)

  print("KERNEL_OK")
</pallas_src>

<mosaic_0001>
module attributes {stable_mosaic.version = 11 : i64} {
  func.func @_normalize_kernel(%arg0: i32, %arg1: memref<32x128xf32, #tpu.memory_space<vmem>>, %arg2: memref<32x128xi8, #tpu.memory_space<vmem>>, %arg3: memref<1x128xf32, #tpu.memory_space<vmem>>, %arg4: memref<1x128xf32, #tpu.memory_space<vmem>>, %arg5: memref<1x128xf32, #tpu.memory_space<vmem>>, %arg6: memref<1x128xf32, #tpu.memory_space<vmem>>, %arg7: memref<1x128xf32, #tpu.memory_space<vmem>>, %arg8: memref<1x128xf32, #tpu.memory_space<vmem>>, %arg9: memref<32x256xf32, #tpu.memory_space<vmem>>) attributes {dimension_semantics = [#tpu.dimension_semantics<parallel>], iteration_bounds = array<i64: 2>, scalar_prefetch = 0 : i64, scratch_operands = 0 : i64, tpu.core_type = #tpu.core_type<tc>, window_params = [{transform_indices = @transform_0, window_bounds = array<i64: 32, 128>}, {transform_indices = @transform_1, window_bounds = array<i64: 32, 128>}, {pipeline_mode = #tpu.pipeline_mode<synchronous>, transform_indices = @transform_2, window_bounds = array<i64: 1, 128>}, {pipeline_mode = #tpu.pipeline_mode<synchronous>, transform_indices = @transform_3, window_bounds = array<i64: 1, 128>}, {pipeline_mode = #tpu.pipeline_mode<synchronous>, transform_indices = @transform_4, window_bounds = array<i64: 1, 128>}, {pipeline_mode = #tpu.pipeline_mode<synchronous>, transform_indices = @transform_5, window_bounds = array<i64: 1, 128>}, {pipeline_mode = #tpu.pipeline_mode<synchronous>, transform_indices = @transform_6, window_bounds = array<i64: 1, 128>}, {pipeline_mode = #tpu.pipeline_mode<synchronous>, transform_indices = @transform_7, window_bounds = array<i64: 1, 128>}, {transform_indices = @transform_8, window_bounds = array<i64: 32, 256>}]} {
    %c0 = arith.constant 0 : index
    %c0_0 = arith.constant 0 : index
    %0 = vector.load %arg1[%c0, %c0_0] : memref<32x128xf32, #tpu.memory_space<vmem>>, vector<32x128xf32>
    %1 = tpu.bitcast %0 : vector<32x128xf32> -> vector<32x128xi32>
    %c-2147483648_i32 = arith.constant -2147483648 : i32
    %2 = vector.broadcast %c-2147483648_i32 : i32 to vector<32x128xi32>
    %3 = arith.andi %1, %2 : vector<32x128xi32>
    %c2147483647_i32 = arith.constant 2147483647 : i32
    %4 = vector.broadcast %c2147483647_i32 : i32 to vector<32x128xi32>
    %5 = arith.andi %1, %4 : vector<32x128xi32>
    %6 = tpu.bitcast %5 : vector<32x128xi32> -> vector<32x128xf32>
    %cst = arith.constant 0x7F800000 : f32
    %7 = vector.broadcast %cst : f32 to vector<32x128xf32>
    %8 = arith.cmpf olt, %6, %7 : vector<32x128xf32>
    %cst_1 = arith.constant 0.000000e+00 : f32
    %9 = vector.broadcast %cst_1 : f32 to vector<32x128xf32>
    %10 = arith.select %8, %6, %9 : vector<32x128xi1>, vector<32x128xf32>
    %11 = math.log1p %10 : vector<32x128xf32>
    %12 = tpu.bitcast %11 : vector<32x128xf32> -> vector<32x128xi32>
    %13 = arith.ori %12, %3 : vector<32x128xi32>
    %14 = tpu.bitcast %13 : vector<32x128xi32> -> vector<32x128xf32>
    %c0_2 = arith.constant 0 : index
    %c0_3 = arith.constant 0 : index
    %15 = vector.load %arg3[%c0_2, %c0_3] : memref<1x128xf32, #tpu.memory_space<vmem>>, vector<1x128xf32>
    %16 = vector.broadcast %15 : vector<1x128xf32> to vector<32x128xf32>
    %17 = arith.mulf %14, %16 : vector<32x128xf32>
    %c0_4 = arith.constant 0 : index
    %c0_5 = arith.constant 0 : index
    %18 = vector.load %arg4[%c0_4, %c0_5] : memref<1x128xf32, #tpu.memory_space<vmem>>, vector<1x128xf32>
    %19 = vector.broadcast %18 : vector<1x128xf32> to vector<32x128xf32>
    %20 = arith.addf %17, %19 : vector<32x128xf32>
    %cst_6 = arith.constant -3.000000e+00 : f32
    %cst_7 = arith.constant 3.000000e+00 : f32
    %21 = vector.broadcast %cst_6 : f32 to vector<32x128xf32>
    %22 = arith.maximumf %21, %20 : vector<32x128xf32>
    %23 = vector.broadcast %cst_7 : f32 to vector<32x128xf32>
    %24 = arith.minimumf %23, %22 : vector<32x128xf32>
    %c0_8 = arith.constant 0 : index
    %c0_9 = arith.constant 0 : index
    %25 = vector.load %arg2[%c0_8, %c0_9] : memref<32x128xi8, #tpu.memory_space<vmem>>, vector<32x128xi8>
    %26 = arith.sitofp %25 : vector<32x128xi8> to vector<32x128xf32>
    %cst_10 = arith.constant dense<0.000000e+00> : vector<32xf32>
    %27 = vector.multi_reduction <add>, %24, %cst_10 [1] : vector<32x128xf32> to vector<32xf32>
    %28 = vector.shape_cast %27 : vector<32xf32> to vector<32x1xf32>
    %cst_11 = arith.constant dense<0.000000e+00> : vector<32xf32>
    %29 = vector.multi_reduction <add>, %26, %cst_11 [1] : vector<32x128xf32> to vector<32xf32>
    %30 = vector.shape_cast %29 : vector<32xf32> to vector<32x1xf32>
    %31 = arith.addf %28, %30 : vector<32x1xf32>
    %32 = arith.mulf %24, %24 : vector<32x128xf32>
    %cst_12 = arith.constant dense<0.000000e+00> : vector<32xf32>
    %33 = vector.multi_reduction <add>, %32, %cst_12 [1] : vector<32x128xf32> to vector<32xf32>
    %34 = vector.shape_cast %33 : vector<32xf32> to vector<32x1xf32>
    %35 = arith.mulf %26, %26 : vector<32x128xf32>
    %cst_13 = arith.constant dense<0.000000e+00> : vector<32xf32>
    %36 = vector.multi_reduction <add>, %35, %cst_13 [1] : vector<32x128xf32> to vector<32xf32>
    %37 = vector.shape_cast %36 : vector<32xf32> to vector<32x1xf32>
    %38 = arith.addf %34, %37 : vector<32x1xf32>
    %cst_14 = arith.constant 3.906250e-03 : f32
    %39 = vector.broadcast %cst_14 : f32 to vector<32x1xf32>
    %40 = arith.mulf %31, %39 : vector<32x1xf32>
    %cst_15 = arith.constant 3.906250e-03 : f32
    %41 = vector.broadcast %cst_15 : f32 to vector<32x1xf32>
    %42 = arith.mulf %38, %41 : vector<32x1xf32>
    %43 = arith.mulf %40, %40 : vector<32x1xf32>
    %44 = arith.subf %42, %43 : vector<32x1xf32>
    %cst_16 = arith.constant 0.000000e+00 : f32
    %45 = vector.broadcast %cst_16 : f32 to vector<32x1xf32>
    %46 = arith.maximumf %44, %45 : vector<32x1xf32>
    %cst_17 = arith.constant 9.99999974E-6 : f32
    %47 = vector.broadcast %cst_17 : f32 to vector<32x1xf32>
    %48 = arith.addf %46, %47 : vector<32x1xf32>
    %49 = math.rsqrt %48 : vector<32x1xf32>
    %50 = vector.broadcast %40 : vector<32x1xf32> to vector<32x128xf32>
    %51 = arith.subf %24, %50 : vector<32x128xf32>
    %52 = vector.broadcast %49 : vector<32x1xf32> to vector<32x128xf32>
    %53 = arith.mulf %51, %52 : vector<32x128xf32>
    %c0_18 = arith.constant 0 : index
    %c0_19 = arith.constant 0 : index
    %54 = vector.load %arg5[%c0_18, %c0_19] : memref<1x128xf32, #tpu.memory_space<vmem>>, vector<1x128xf32>
    %55 = vector.broadcast %54 : vector<1x128xf32> to vector<32x128xf32>
    %56 = arith.mulf %53, %55 : vector<32x128xf32>
    %c0_20 = arith.constant 0 : index
    %c0_21 = arith.constant 0 : index
    %57 = vector.load %arg7[%c0_20, %c0_21] : memref<1x128xf32, #tpu.memory_space<vmem>>, vector<1x128xf32>
    %58 = vector.broadcast %57 : vector<1x128xf32> to vector<32x128xf32>
    %59 = arith.addf %56, %58 : vector<32x128xf32>
    %c0_22 = arith.constant 0 : index
    %c0_23 = arith.constant 0 : index
    %60 = vector.load %arg9[%c0_22, %c0_23] : memref<32x256xf32, #tpu.memory_space<vmem>>, vector<32x128xf32>
    tpu.vector_store %arg9[%c0_22, %c0_23], %59 {strides = array<i32>} : memref<32x256xf32, #tpu.memory_space<vmem>>, vector<32x128xf32>,
    %61 = vector.broadcast %40 : vector<32x1xf32> to vector<32x128xf32>
    %62 = arith.subf %26, %61 : vector<32x128xf32>
    %63 = vector.broadcast %49 : vector<32x1xf32> to vector<32x128xf32>
    %64 = arith.mulf %62, %63 : vector<32x128xf32>
    %c0_24 = arith.constant 0 : index
    %c0_25 = arith.constant 0 : index
    %65 = vector.load %arg6[%c0_24, %c0_25] : memref<1x128xf32, #tpu.memory_space<vmem>>, vector<1x128xf32>
    %66 = vector.broadcast %65 : vector<1x128xf32> to vector<32x128xf32>
    %67 = arith.mulf %64, %66 : vector<32x128xf32>
    %c0_26 = arith.constant 0 : index
    %c0_27 = arith.constant 0 : index
    %68 = vector.load %arg8[%c0_26, %c0_27] : memref<1x128xf32, #tpu.memory_space<vmem>>, vector<1x128xf32>
    %69 = vector.broadcast %68 : vector<1x128xf32> to vector<32x128xf32>
    %70 = arith.addf %67, %69 : vector<32x128xf32>
    %c0_28 = arith.constant 0 : index
    %c128 = arith.constant 128 : index
    %71 = vector.load %arg9[%c0_28, %c128] : memref<32x256xf32, #tpu.memory_space<vmem>>, vector<32x128xf32>
    tpu.vector_store %arg9[%c0_28, %c128], %70 {strides = array<i32>} : memref<32x256xf32, #tpu.memory_space<vmem>>, vector<32x128xf32>,
    return
  }
  func.func @transform_0(%arg0: i32) -> (i32, i32) {
    %c0_i32 = arith.constant 0 : i32
    %c0_i32_0 = arith.constant 0 : i32
    return %arg0, %c0_i32 : i32, i32
  }
  func.func @transform_1(%arg0: i32) -> (i32, i32) {
    %c0_i32 = arith.constant 0 : i32
    %c0_i32_0 = arith.constant 0 : i32
    return %arg0, %c0_i32 : i32, i32
  }
  func.func @transform_2(%arg0: i32) -> (i32, i32) {
    %c0_i32 = arith.constant 0 : i32
    %c0_i32_0 = arith.constant 0 : i32
    %c0_i32_1 = arith.constant 0 : i32
    return %c0_i32, %c0_i32_0 : i32, i32
  }
  func.func @transform_3(%arg0: i32) -> (i32, i32) {
    %c0_i32 = arith.constant 0 : i32
    %c0_i32_0 = arith.constant 0 : i32
    %c0_i32_1 = arith.constant 0 : i32
    return %c0_i32, %c0_i32_0 : i32, i32
  }
  func.func @transform_4(%arg0: i32) -> (i32, i32) {
    %c0_i32 = arith.constant 0 : i32
    %c0_i32_0 = arith.constant 0 : i32
    %c0_i32_1 = arith.constant 0 : i32
    return %c0_i32, %c0_i32_0 : i32, i32
  }
  func.func @transform_5(%arg0: i32) -> (i32, i32) {
    %c0_i32 = arith.constant 0 : i32
    %c0_i32_0 = arith.constant 0 : i32
    %c0_i32_1 = arith.constant 0 : i32
    return %c0_i32, %c0_i32_0 : i32, i32
  }
  func.func @transform_6(%arg0: i32) -> (i32, i32) {
    %c0_i32 = arith.constant 0 : i32
    %c0_i32_0 = arith.constant 0 : i32
    %c0_i32_1 = arith.constant 0 : i32
    return %c0_i32, %c0_i32_0 : i32, i32
  }
  func.func @transform_7(%arg0: i32) -> (i32, i32) {
    %c0_i32 = arith.constant 0 : i32
    %c0_i32_0 = arith.constant 0 : i32
    %c0_i32_1 = arith.constant 0 : i32
    return %c0_i32, %c0_i32_0 : i32, i32
  }
  func.func @transform_8(%arg0: i32) -> (i32, i32) {
    %c0_i32 = arith.constant 0 : i32
    %c0_i32_0 = arith.constant 0 : i32
    return %arg0, %c0_i32 : i32, i32
  }
}

module attributes {stable_mosaic.version = 11 : i64} {
  func.func @_bn_stats_kernel(%arg0: i32, %arg1: memref<32x128xf32, #tpu.memory_space<vmem>>, %arg2: memref<1x128xf32, #tpu.memory_space<vmem>>, %arg3: memref<1x128xf32, #tpu.memory_space<vmem>>, %arg4: memref<1x128xf32, #tpu.memory_space<vmem>>, %arg5: memref<1x128xf32, #tpu.memory_space<vmem>>, %arg6: memref<8x128xf32, #tpu.memory_space<vmem>>, %arg7: memref<8x128xf32, #tpu.memory_space<vmem>>) attributes {dimension_semantics = [#tpu.dimension_semantics<arbitrary>], iteration_bounds = array<i64: 2>, scalar_prefetch = 0 : i64, scratch_operands = 2 : i64, tpu.core_type = #tpu.core_type<tc>, window_params = [{transform_indices = @transform_0, window_bounds = array<i64: 32, 128>}, {pipeline_mode = #tpu.pipeline_mode<synchronous>, transform_indices = @transform_1, window_bounds = array<i64: 1, 128>}, {pipeline_mode = #tpu.pipeline_mode<synchronous>, transform_indices = @transform_2, window_bounds = array<i64: 1, 128>}, {pipeline_mode = #tpu.pipeline_mode<synchronous>, transform_indices = @transform_3, window_bounds = array<i64: 1, 128>}, {pipeline_mode = #tpu.pipeline_mode<synchronous>, transform_indices = @transform_4, window_bounds = array<i64: 1, 128>}]} {
    %c0_i32 = arith.constant 0 : i32
    %0 = arith.cmpi eq, %arg0, %c0_i32 : i32
    %1 = arith.extui %0 : i1 to i32
    %c0_i32_0 = arith.constant 0 : i32
    %2 = arith.cmpi ne, %1, %c0_i32_0 : i32
    scf.if %2 {
      %cst_14 = arith.constant 0.000000e+00 : f32
      %31 = vector.broadcast %cst_14 : f32 to vector<8x128xf32>
      %c0_15 = arith.constant 0 : index
      %c0_16 = arith.constant 0 : index
      %32 = vector.load %arg6[%c0_15, %c0_16] : memref<8x128xf32, #tpu.memory_space<vmem>>, vector<8x128xf32>
      tpu.vector_store %arg6[%c0_15, %c0_16], %31 {strides = array<i32>} : memref<8x128xf32, #tpu.memory_space<vmem>>, vector<8x128xf32>,
      %cst_17 = arith.constant 0.000000e+00 : f32
      %33 = vector.broadcast %cst_17 : f32 to vector<8x128xf32>
      %c0_18 = arith.constant 0 : index
      %c0_19 = arith.constant 0 : index
      %34 = vector.load %arg7[%c0_18, %c0_19] : memref<8x128xf32, #tpu.memory_space<vmem>>, vector<8x128xf32>
      tpu.vector_store %arg7[%c0_18, %c0_19], %33 {strides = array<i32>} : memref<8x128xf32, #tpu.memory_space<vmem>>, vector<8x128xf32>,
    } else {
    }
    %c0 = arith.constant 0 : index
    %c0_1 = arith.constant 0 : index
    %3 = vector.load %arg1[%c0, %c0_1] : memref<32x128xf32, #tpu.memory_space<vmem>>, vector<32x128xf32>
    %4 = tpu.bitcast %3 : vector<32x128xf32> -> vector<32x128xi32>
    %c-2147483648_i32 = arith.constant -2147483648 : i32
    %5 = vector.broadcast %c-2147483648_i32 : i32 to vector<32x128xi32>
    %6 = arith.andi %4, %5 : vector<32x128xi32>
    %c2147483647_i32 = arith.constant 2147483647 : i32
    %7 = vector.broadcast %c2147483647_i32 : i32 to vector<32x128xi32>
    %8 = arith.andi %4, %7 : vector<32x128xi32>
    %9 = tpu.bitcast %8 : vector<32x128xi32> -> vector<32x128xf32>
    %cst = arith.constant 0x7F800000 : f32
    %10 = vector.broadcast %cst : f32 to vector<32x128xf32>
    %11 = arith.cmpf olt, %9, %10 : vector<32x128xf32>
    %cst_2 = arith.constant 0.000000e+00 : f32
    %12 = vector.broadcast %cst_2 : f32 to vector<32x128xf32>
    %13 = arith.select %11, %9, %12 : vector<32x128xi1>, vector<32x128xf32>
    %14 = math.log1p %13 : vector<32x128xf32>
    %15 = tpu.bitcast %14 : vector<32x128xf32> -> vector<32x128xi32>
    %16 = arith.ori %15, %6 : vector<32x128xi32>
    %17 = tpu.bitcast %16 : vector<32x128xi32> -> vector<32x128xf32>
    %18 = vector.shape_cast %17 : vector<32x128xf32> to vector<4x8x128xf32>
    %c0_3 = arith.constant 0 : index
    %c0_4 = arith.constant 0 : index
    %19 = vector.load %arg6[%c0_3, %c0_4] : memref<8x128xf32, #tpu.memory_space<vmem>>, vector<8x128xf32>
    %cst_5 = arith.constant dense<0.000000e+00> : vector<8x128xf32>
    %20 = vector.multi_reduction <add>, %18, %cst_5 [0] : vector<4x8x128xf32> to vector<8x128xf32>
    %21 = arith.addf %19, %20 : vector<8x128xf32>
    %c0_6 = arith.constant 0 : index
    %c0_7 = arith.constant 0 : index
    %22 = vector.load %arg6[%c0_6, %c0_7] : memref<8x128xf32, #tpu.memory_space<vmem>>, vector<8x128xf32>
    tpu.vector_store %arg6[%c0_6, %c0_7], %21 {strides = array<i32>} : memref<8x128xf32, #tpu.memory_space<vmem>>, vector<8x128xf32>,
    %c0_8 = arith.constant 0 : index
    %c0_9 = arith.constant 0 : index
    %23 = vector.load %arg7[%c0_8, %c0_9] : memref<8x128xf32, #tpu.memory_space<vmem>>, vector<8x128xf32>
    %24 = arith.mulf %18, %18 : vector<4x8x128xf32>
    %cst_10 = arith.constant dense<0.000000e+00> : vector<8x128xf32>
    %25 = vector.multi_reduction <add>, %24, %cst_10 [0] : vector<4x8x128xf32> to vector<8x128xf32>
    %26 = arith.addf %23, %25 : vector<8x128xf32>
    %c0_11 = arith.constant 0 : index
    %c0_12 = arith.constant 0 : index
    %27 = vector.load %arg7[%c0_11, %c0_12] : memref<8x128xf32, #tpu.memory_space<vmem>>, vector<8x128xf32>
    tpu.vector_store %arg7[%c0_11, %c0_12], %26 {strides = array<i32>} : memref<8x128xf32, #tpu.memory_space<vmem>>, vector<8x128xf32>,
    %c1_i32 = arith.constant 1 : i32
    %28 = arith.cmpi eq, %arg0, %c1_i32 : i32
    %29 = arith.extui %28 : i1 to i32
    %c0_i32_13 = arith.constant 0 : i32
    %30 = arith.cmpi ne, %29, %c0_i32_13 : i32
    scf.if %30 {
      %c0_14 = arith.constant 0 : index
      %c0_15 = arith.constant 0 : index
      %31 = vector.load %arg6[%c0_14, %c0_15] : memref<8x128xf32, #tpu.memory_space<vmem>>, vector<8x128xf32>
      %cst_16 = arith.constant dense<0.000000e+00> : vector<128xf32>
      %32 = vector.multi_reduction <add>, %31, %cst_16 [0] : vector<8x128xf32> to vector<128xf32>
      %33 = vector.shape_cast %32 : vector<128xf32> to vector<1x128xf32>
      %c0_17 = arith.constant 0 : index
      %c0_18 = arith.constant 0 : index
      %34 = vector.load %arg7[%c0_17, %c0_18] : memref<8x128xf32, #tpu.memory_space<vmem>>, vector<8x128xf32>
      %cst_19 = arith.constant dense<0.000000e+00> : vector<128xf32>
      %35 = vector.multi_reduction <add>, %34, %cst_19 [0] : vector<8x128xf32> to vector<128xf32>
      %36 = vector.shape_cast %35 : vector<128xf32> to vector<1x128xf32>
      %cst_20 = arith.constant 1.562500e-02 : f32
      %37 = vector.broadcast %cst_20 : f32 to vector<1x128xf32>
      %38 = arith.mulf %33, %37 : vector<1x128xf32>
      %cst_21 = arith.constant 1.562500e-02 : f32
      %39 = vector.broadcast %cst_21 : f32 to vector<1x128xf32>
      %40 = arith.mulf %36, %39 : vector<1x128xf32>
      %41 = arith.mulf %38, %38 : vector<1x128xf32>
      %42 = arith.subf %40, %41 : vector<1x128xf32>
      %cst_22 = arith.constant 0.000000e+00 : f32
      %43 = vector.broadcast %cst_22 : f32 to vector<1x128xf32>
      %44 = arith.maximumf %42, %43 : vector<1x128xf32>
      %c0_23 = arith.constant 0 : index
      %c0_24 = arith.constant 0 : index
      %45 = vector.load %arg2[%c0_23, %c0_24] : memref<1x128xf32, #tpu.memory_space<vmem>>, vector<1x128xf32>
      %cst_25 = arith.constant 9.99999974E-6 : f32
      %46 = vector.broadcast %cst_25 : f32 to vector<1x128xf32>
      %47 = arith.addf %44, %46 : vector<1x128xf32>
      %48 = math.rsqrt %47 : vector<1x128xf32>
      %49 = arith.mulf %45, %48 : vector<1x128xf32>
      %c0_26 = arith.constant 0 : index
      %c0_27 = arith.constant 0 : index
      %50 = vector.load %arg4[%c0_26, %c0_27] : memref<1x128xf32, #tpu.memory_space<vmem>>, vector<1x128xf32>
      tpu.vector_store %arg4[%c0_26, %c0_27], %49 {strides = array<i32>} : memref<1x128xf32, #tpu.memory_space<vmem>>, vector<1x128xf32>,
      %c0_28 = arith.constant 0 : index
      %c0_29 = arith.constant 0 : index
      %51 = vector.load %arg3[%c0_28, %c0_29] : memref<1x128xf32, #tpu.memory_space<vmem>>, vector<1x128xf32>
      %52 = arith.mulf %38, %49 : vector<1x128xf32>
      %53 = arith.subf %51, %52 : vector<1x128xf32>
      %c0_30 = arith.constant 0 : index
      %c0_31 = arith.constant 0 : index
      %54 = vector.load %arg5[%c0_30, %c0_31] : memref<1x128xf32, #tpu.memory_space<vmem>>, vector<1x128xf32>
      tpu.vector_store %arg5[%c0_30, %c0_31], %53 {strides = array<i32>} : memref<1x128xf32, #tpu.memory_space<vmem>>, vector<1x128xf32>,
    } else {
    }
    return
  }
  func.func @transform_0(%arg0: i32) -> (i32, i32) {
    %c0_i32 = arith.constant 0 : i32
    %c0_i32_0 = arith.constant 0 : i32
    return %arg0, %c0_i32 : i32, i32
  }
  func.func @transform_1(%arg0: i32) -> (i32, i32) {
    %c0_i32 = arith.constant 0 : i32
    %c0_i32_0 = arith.constant 0 : i32
    %c0_i32_1 = arith.constant 0 : i32
    return %c0_i32, %c0_i32_0 : i32, i32
  }
  func.func @transform_2(%arg0: i32) -> (i32, i32) {
    %c0_i32 = arith.constant 0 : i32
    %c0_i32_0 = arith.constant 0 : i32
    %c0_i32_1 = arith.constant 0 : i32
    return %c0_i32, %c0_i32_0 : i32, i32
  }
  func.func @transform_3(%arg0: i32) -> (i32, i32) {
    %c0_i32 = arith.constant 0 : i32
    %c0_i32_0 = arith.constant 0 : i32
    %c0_i32_1 = arith.constant 0 : i32
    return %c0_i32, %c0_i32_0 : i32, i32
  }
  func.func @transform_4(%arg0: i32) -> (i32, i32) {
    %c0_i32 = arith.constant 0 : i32
    %c0_i32_0 = arith.constant 0 : i32
    %c0_i32_1 = arith.constant 0 : i32
    return %c0_i32, %c0_i32_0 : i32, i32
  }
}

</mosaic_0001>

<bundles_post_ra>
// kernel: double_norm_log.2
= control target key start
LH: loop header
LB: loop body
LE: loop exit
PB: predicated region body
PF: predicated region fallthrough
CT: control target
= control target key end

     0   :  { %10 = vsyncpa [#allocation5], 0  ;;  %s875_s0 = inlined_call_operand.hbm [shape: f32[64,128], index: 0, kind: input, shape index: {}]   ;;  %s876_s1 = inlined_call_operand.hbm [shape: f32[1,128], index: 1, kind: input, shape index: {}]   ;;  %s877_s2 = inlined_call_operand.hbm [shape: f32[1,128], index: 2, kind: input, shape index: {}]   ;;  %s878_s3 = inlined_call_operand.vmem [shape: f32[1,128], index: 3, kind: output, shape index: {0}]   ;;  %s879_s4 = inlined_call_operand.vmem [shape: f32[1,128], index: 4, kind: output, shape index: {1}]  }
   0x1   :  { %12 = vsyncpa [#allocation5 + $0x1], 0 }
   0x2   :  { %13 = vsyncpa [#allocation7], 0  ;;  %s668_s15 = smov 0   ;;  %s670_s16 = smov 0  }
   0x3   :  { %s672_s17 = smov 0   ;;  %s674_s18 = smov 0  }
   0x4 LB: > { %s687_s19 = sadd.s32 4294967295, %s635_s18   ;;  %s690_s20 = sadd.s32 1, %s635_s18   ;;  %s635_s18 = sphi %s674_s18, %s902_s18   ;;  %s631_s17 = sphi %s672_s17, %s901_s17   ;;  %s627_s16 = sphi %s670_s16, %s900_s16   ;;  %s623_s15 = sphi %s668_s15, %s899_s15  }
   0x5   : > { %s23_s21 = ssub.s32 %s635_s18, %s690_s20  ;;  %s26_s22 = sadd.s32 1, %s631_s17 }
   0x6   : > { %p24_p0 = scmp.eq.s32.totalorder %s23_s21, 0  ;;  %p33_p1 = scmp.ne.s32.totalorder %s631_s17, %s627_s16 }
   0x7   : > { %p34_p2 = scmp.eq.s32.totalorder %s635_s18, 0  ;;  %p39_p3 = scmp.ne.s32.totalorder %s627_s16, %s623_s15 }
   0x8   : > { %s700_s23 = scalar_select %p24_p0, %s631_s17, %s26_s22  }
   0x9   : > { %p702_p4 = por %p34_p2, %p33_p1  ;;  %p880_p5 = scmp.eq.s32.totalorder %s687_s19, 0 }
   0xa   : > { %p422_p6 = scmp.ge.s32.totalorder %s635_s18, 1  ;;  %p134_p7 = scmp.lt.s32.totalorder %s635_s18, 3 }
   0xb   : > { %p711_p8 = por %p880_p5, %p39_p3  ;;  %s637_s27 = smov [#allocation6]  }
   0xc   : > { %p716_p10 = pnand %p422_p6, %p134_p7  ;;  %s147_s28 = sshll.u32 %s637_s27, 4  ;;  %s148_s28 = int_to_ptr.vmem [resolvable:$true] %s147_s28 }
   0xd   : > { %s885_s25 = scalar_select %p711_p8, 1, 0 }
   0xe   : > { %s886_s26 = scalar_select %p716_p10, 1, 0 }
   0xf   : > { %p448_p11 = pneg %p716_p10  ;;  %p461_p12 = scmp.lt.s32.totalorder %s635_s18, 2 }
  0x10   : > { %s638_s30 = smov [#allocation8]   ;;  %s169_s7 = sand.u32 1, %s631_s17  }
  0x11   : > { %p725_p13 = pnand %p448_p11, %p880_p5  ;;  %s158_s5 = sshll.u32 %s638_s30, 4  ;;  %s735_s5 = int_to_ptr.vmem [resolvable:$true] %s158_s5 }
  0x12   : > { %p731_p0 = pnand %p461_p12, %p702_p4  ;;  %s511_s10 = scalar_lea.hbm %s876_s1, 16 }
  0x13   : > { %p512_p1 = scmp.ne.s32.totalorder %s876_s1, %s511_s10  ;;  %p513_p2 = pneg %p725_p13 }
  0x14   : > { %s888_s6 = scalar_select %p731_p0, 1, 0 }
  0x15   : > { %p514_p3 = pnand %p513_p2, %p512_p1  ;;  %p518_p6 = scmp.lt.u32.totalorder %s511_s10, %s876_s1 }
  0x17   : > { %p515_p4 = pneg %p514_p3 }
  0x19   : > { %p520_p7 = pnand %p518_p6, %p515_p4 }
  0x1b   : > { %523 = shalt.err (!%p520_p7)
}
  0x1c   : > { %s524_s15 = scalar_lea.vmem %s148_s28, 16  ;;  %s531_s21 = scalar_lea.vmem %s148_s28, 32 }
  0x1d   : > { %p525_p11 = scmp.ne.s32.totalorder %s148_s28, %s524_s15  ;;  %p532_p5 = scmp.lt.s32.totalorder %s148_s28, %s148_s28 }
  0x1e   : > { %p533_p8 = scmp.lt.s32.totalorder %s531_s21, %s524_s15 }
  0x1f   : > { %p527_p12 = pnand %p525_p11, %p513_p2 }
  0x20   : > { %p534_p10 = por %p533_p8, %p532_p5 }
  0x21   : > { %p528_p9 = pneg %p527_p12 }
  0x23   : > { %p535_p0 = pnand %p534_p10, %p528_p9 }
  0x25   : > { %538 = shalt.err (!%p535_p0)
}
  0x26   : > { %451 = dma.hbm_to_vmem [thread:$0]  (!%p725_p13), %s876_s1, 16, %s148_s28, [#allocation7]  }
  0x27   : > { %s539_s8 = scalar_lea.hbm %s877_s2, 16 }
  0x28   : > { %p540_p1 = scmp.ne.s32.totalorder %s877_s2, %s539_s8  ;;  %p546_p9 = scmp.lt.u32.totalorder %s539_s8, %s877_s2 }
  0x2a   : > { %p542_p5 = pnand %p540_p1, %p513_p2 }
  0x2c   : > { %p543_p8 = pneg %p542_p5 }
  0x2e   : > { %p548_p10 = pnand %p546_p9, %p543_p8 }
  0x30   : > { %551 = shalt.err (!%p548_p10)
}
  0x31   : > { %s552_s28 = scalar_lea.vmem %s735_s5, 16  ;;  %s559_s13 = scalar_lea.vmem %s735_s5, 32 }
  0x32   : > { %p553_p0 = scmp.ne.s32.totalorder %s735_s5, %s552_s28  ;;  %p560_p6 = scmp.lt.s32.totalorder %s735_s5, %s735_s5 }
  0x33   : > { %p561_p7 = scmp.lt.s32.totalorder %s559_s13, %s552_s28 }
  0x34   : > { %p555_p3 = pnand %p553_p0, %p513_p2 }
  0x35   : > { %p562_p11 = por %p561_p7, %p560_p6 }
  0x36   : > { %p556_p4 = pneg %p555_p3 }
  0x38   : > { %p563_p12 = pnand %p562_p11, %p556_p4 }
  0x3a   : > { %566 = shalt.err (!%p563_p12)
}
  0x3b   : > { %454 = dma.hbm_to_vmem [thread:$0]  (!%p725_p13), %s877_s2, 16, %s735_s5, [#allocation7]  }
  0x3c   : > { %s426_s21 = sshll.u32 %s169_s7, 5  ;;  %s437_s22 = sshll.u32 %s635_s18, 9 }
  0x3d   : > { %s792_s30 = scalar_lea.hbm %s875_s0, %s437_s22  ;;  %s173_s29 = scalar_lea.vmem [#allocation4], %s426_s21 }
  0x3e   : > { %s180_s8 = sshll.u32 %s173_s29, 4  ;;  %s798_s9 = scalar_lea.sflag [#allocation5], %s169_s7  ;;  %s794_s8 = int_to_ptr.vmem [resolvable:$true] %s180_s8 }
  0x3f   : > { %s567_s5 = scalar_lea.hbm %s792_s30, 512  ;;  %p889_p2 = scmp.ne.s32.totalorder %s888_s6, 0 }
  0x40   : > { %p568_p13 = scmp.ne.s32.totalorder %s792_s30, %s567_s5  ;;  %s572_s11 = scalar_lea.hbm %s875_s0, 1024 }
  0x41   : > { %p569_p1 = pneg %p889_p2  ;;  %p573_p9 = scmp.lt.u32.totalorder %s792_s30, %s875_s0 }
  0x42   : > { %p574_p10 = scmp.lt.u32.totalorder %s572_s11, %s567_s5  ;;  %p576_p3 = scmp.lt.u32.totalorder %s567_s5, %s792_s30 }
  0x43   : > { %p570_p5 = pnand %p569_p1, %p568_p13 }
  0x44   : > { %p575_p0 = por %p574_p10, %p573_p9 }
  0x45   : > { %p571_p8 = pneg %p570_p5 }
  0x46   : > { %p577_p4 = por %p576_p3, %p575_p0 }
  0x48   : > { %p578_p6 = pnand %p577_p4, %p571_p8 }
  0x4a   : > { %581 = shalt.err (!%p578_p6)
}
  0x4b   : > { %s582_s7 = scalar_lea.vmem %s794_s8, 512  ;;  %s639_s13 = smov [#allocation4]  }
  0x4c   : > { %p583_p7 = scmp.ne.s32.totalorder %s794_s8, %s582_s7  ;;  %s587_s14 = sshll.u32 %s639_s13, 4  ;;  %s588_s14 = int_to_ptr.vmem [resolvable:$false] %s587_s14 }
  0x4d   : > { %s589_s15 = scalar_lea.vmem %s588_s14, 1024  ;;  %p590_p13 = scmp.lt.s32.totalorder %s794_s8, %s588_s14 }
  0x4e   : > { %p585_p11 = pnand %p583_p7, %p569_p1  ;;  %p591_p5 = scmp.lt.s32.totalorder %s589_s15, %s582_s7 }
  0x50   : > { %p586_p12 = pneg %p585_p11  ;;  %p592_p9 = por %p591_p5, %p590_p13 }
  0x52   : > { %p593_p10 = pnand %p592_p9, %p586_p12 }
  0x54   : > { %596 = shalt.err (!%p593_p10)
}
  0x55   : > { %s640_s21 = smov 128   ;;  %s641_s22 = smov 8  }
  0x56   : > { %458 = dma.hbm_to_vmem [thread:$0]  (!%p889_p2), %s792_s30, 512, %s794_s8, %s798_s9, %s640_s21, %s640_s21, %s641_s22  }
  0x57   : > { %p890_p1 = scmp.ne.s32.totalorder %s886_s26, 0 }
  0x58   : > { %s194_s24 = sand.u32 (!%p890_p1), 1, %s627_s16   ;;  %p891_p8 = scmp.ne.s32.totalorder (!%p890_p1), %s885_s25, 0 }
  0x59   : > { %192 = sbr.rel (%p890_p1) target bundleno = 189 (0xbd), region = 32  ;;  %s430_s27 = sshll.u32 (!%p890_p1), %s194_s24, 5 }
  0x5a   : > { %s195_s29 = scalar_lea.sflag (!%p890_p1), [#allocation5], %s194_s24  ;;  %s198_s5 = scalar_lea.vmem (!%p890_p1), [#allocation4], %s430_s27 }
  0x60   : > { %614 = dma.done.wait (%p891_p8), %s195_s29, 512  }
  0x61   : > { %616 = vsyncadd (%p891_p8), %s195_s29, 4294966784  ;;  %p892_p0 = scmp.eq.s32.totalorder %s687_s19, 0 }
  0x63   : > { %618 = dma.done.wait (%p892_p0), [#allocation7], 32   ;;  %p893_p3 = pmov %p892_p0 }
  0x64   : > { %p894_p2 = scmp.ne.s32.totalorder %s687_s19, 0 }
  0x65   : > { %620 = vsyncadd (%p893_p3), [#allocation7], 4294967264  ;;  %v642_v0 = vmov (!%p894_p2), 0.0  }
  0x66   : > { %230 = sbr.rel (%p894_p2) target bundleno = 109 (0x6d), region = 48  ;;  %231 = vst [vmem:[#allocation2] sm:$0xff] (!%p894_p2), %v642_v0  ;;  %232 = vst [vmem:[#allocation3] sm:$0xff] (!%p894_p2), %v642_v0 }
  0x6d PF: > { %v233_v1 = vld [vmem:[%s198_s5] sm:$0xff]  ;;  %v234_v2 = vld [vmem:[%s198_s5 + $0x8] sm:$0xff]  ;;  %v235_v3 = vld [vmem:[%s198_s5 + $0x10] sm:$0xff]  ;;  %p434_p4 = scmp.ne.s32.totalorder %s687_s19, 1 }
  0x6e   : > { %v839_v4 = vld [vmem:[%s198_s5 + $0x18] sm:$0xff]  ;;  %v245_v5 = vand.u32 2147483647, %v233_v1  ;;  %v246_v6 = vand.u32 2147483647, %v234_v2  ;;  %v241_v27 = vand.u32 2147483648, %v233_v1 }
  0x6f   : > { %v247_v7 = vand.u32 2147483647, %v235_v3  ;;  %v248_v8 = vand.u32 2147483647, %v839_v4  ;;  %v242_v30 = vand.u32 2147483648, %v234_v2  ;;  %v243_v40 = vand.u32 2147483648, %v235_v3 }
  0x70   : > { %vm253_vm0 = vcmp.lt.f32.partialorder %v245_v5, inf  ;;  %vm254_vm1 = vcmp.lt.f32.partialorder %v246_v6, inf  ;;  %v244_v48 = vand.u32 2147483648, %v839_v4  ;;  %v309_v61 = vld [vmem:[#allocation2] sm:$0xff]  ;;  %v315_v1 = vld [vmem:[#allocation3] sm:$0xff] }
  0x71   : > { %vm255_vm2 = vcmp.lt.f32.partialorder %v247_v7, inf  ;;  %v257_v9 = vsel %vm253_vm0, %v245_v5, 0.0  ;;  %vm256_vm3 = vcmp.lt.f32.partialorder %v248_v8, inf  ;;  %v258_v10 = vsel %vm254_vm1, %v246_v6, 0.0 }
  0x72   : > { %v259_v11 = vsel %vm255_vm2, %v247_v7, 0.0  ;;  %v261_v12 = vadd.f32 1.0, %v257_v9  ;;  %v270_v13 = vadd.f32 1.0, %v258_v10  ;;  %v260_v14 = vsel %vm256_vm3, %v248_v8, 0.0 }
  0x73   : > { %v279_v15 = vadd.f32 1.0, %v259_v11  ;;  %v264_v16 = vmul.f32 -0.5, %v257_v9  ;;  %v273_v17 = vmul.f32 -0.5, %v258_v10  ;;  %v282_v18 = vmul.f32 -0.5, %v259_v11 }
  0x74   : > { %501 = vlog2.f32 %v261_v12  ;;  %v288_v19 = vadd.f32 1.0, %v260_v14  ;;  %v267_v21 = vand.u32 2147483647, %v257_v9  ;;  %v291_v23 = vmul.f32 -0.5, %v260_v14 }
  0x75   : > { %503 = vlog2.f32 %v270_v13  ;;  %v265_v20 = vadd.f32 1.0, %v264_v16  ;;  %v274_v22 = vadd.f32 1.0, %v273_v17  ;;  %v276_v24 = vand.u32 2147483647, %v258_v10 }
  0x76   : > { %505 = vlog2.f32 %v279_v15  ;;  %v283_v25 = vadd.f32 1.0, %v282_v18  ;;  %v285_v26 = vand.u32 2147483647, %v259_v11  ;;  %vm842_vm4 = vcmp.lt.f32.partialorder %v267_v21, 0.0004427343 }
  0x77   : > { %507 = vlog2.f32 %v288_v19  ;;  %v266_v28 = vmul.f32 %v265_v20, %v257_v9  ;;  %v275_v32 = vmul.f32 %v274_v22, %v258_v10  ;;  %v292_v33 = vadd.f32 1.0, %v291_v23 }
  0x78   : > { %vm846_vm5 = vcmp.lt.f32.partialorder %v276_v24, 0.0004427343  ;;  %v284_v37 = vmul.f32 %v283_v25, %v259_v11  ;;  %v294_v38 = vand.u32 2147483647, %v260_v14  ;;  %vm286_vm6 = vcmp.lt.f32.partialorder %v285_v26, 0.0004427343 }
  0x79   : > { %v293_v45 = vmul.f32 %v292_v33, %v260_v14  ;;  %v348_v25 = vld [vmem:[#allocation6] sm:$0x1] (!%p434_p4) }
  0x7a   : > { %vm295_vm7 = vcmp.lt.f32.partialorder %v294_v38, 0.0004427343 }
  0x7e   : > { %v502_v29 = vpop.eup %501 }
  0x7f   : > { %v504_v34 = vpop.eup %503  ;;  %v263_v35 = vmul.f32 0.6931472, %v502_v29 }
  0x80   : > { %v506_v39 = vpop.eup %505  ;;  %v272_v41 = vmul.f32 0.6931472, %v504_v34 }
  0x81   : > { %v269_v42 = vsel %vm842_vm4, %v266_v28, %v263_v35  ;;  %v281_v43 = vmul.f32 0.6931472, %v506_v39  ;;  %v508_v47 = vpop.eup %507  ;;  %v353_v28 = vld [vmem:[#allocation8] sm:$0x1] (!%p434_p4) }
  0x82   : > { %v278_v44 = vsel %vm846_vm5, %v275_v32, %v272_v41  ;;  %v301_v46 = vor.u32 %v269_v42, %v241_v27  ;;  %v290_v51 = vmul.f32 0.6931472, %v508_v47 }
  0x83   : > { %v287_v49 = vsel %vm286_vm6, %v284_v37, %v281_v43  ;;  %v302_v50 = vor.u32 %v278_v44, %v242_v30 }
  0x84   : > { %v303_v52 = vor.u32 %v287_v49, %v243_v40  ;;  %v316_v53 = vmul.f32 %v301_v46, %v301_v46  ;;  %v296_v56 = vsel %vm295_vm7, %v293_v45, %v290_v51 }
  0x85   : > { %v310_v54 = vadd.f32 %v302_v50, %v301_v46  ;;  %v317_v55 = vmul.f32 %v302_v50, %v302_v50  ;;  %v304_v58 = vor.u32 %v296_v56, %v244_v48 }
  0x86   : > { %v318_v57 = vmul.f32 %v303_v52, %v303_v52 }
  0x87   : > { %v311_v59 = vadd.f32 %v310_v54, %v303_v52  ;;  %v320_v60 = vadd.f32 %v317_v55, %v316_v53  ;;  %v319_v63 = vmul.f32 %v304_v58, %v304_v58 }
  0x89   : > { %v312_v62 = vadd.f32 %v311_v59, %v304_v58  ;;  %v321_v0 = vadd.f32 %v320_v60, %v318_v57  ;;  %328 = sbr.rel (%p434_p4) target bundleno = 189 (0xbd), region = 52 }
  0x8b   : > { %v313_v2 = vadd.f32 %v312_v62, %v309_v61  ;;  %v322_v3 = vadd.f32 %v321_v0, %v319_v63 }
  0x8d   : > { %314 = vst [vmem:[#allocation2] sm:$0xff] %v313_v2  ;;  %v323_v4 = vadd.f32 %v322_v3, %v315_v1 }
  0x8f   : > { %324 = vst [vmem:[#allocation3] sm:$0xff] %v323_v4 }
  0x94   : > { %v329_v5 = vld [vmem:[#allocation2] sm:$0xff] }
  0x95   : > { %v330_v7 = vrot.slane %v329_v5, 4 }
  0x96   : > { %v336_v6 = vld [vmem:[#allocation3] sm:$0xff] }
  0x97   : > { %v337_v8 = vrot.slane %v336_v6, 4  ;;  %v331_v9 = vadd.f32 %v330_v7, %v329_v5 }
  0x99   : > { %v338_v10 = vadd.f32 %v337_v8, %v336_v6  ;;  %v332_v11 = vrot.slane %v331_v9, 2 }
  0x9b   : > { %v339_v12 = vrot.slane %v338_v10, 2  ;;  %v333_v13 = vadd.f32 %v332_v11, %v331_v9 }
  0x9d   : > { %v340_v14 = vadd.f32 %v339_v12, %v338_v10  ;;  %v334_v15 = vrot.slane %v333_v13, 1 }
  0x9f   : > { %v341_v16 = vrot.slane %v340_v14, 1  ;;  %v335_v17 = vadd.f32 %v334_v15, %v333_v13 }
  0xa1   : > { %v342_v18 = vadd.f32 %v341_v16, %v340_v14  ;;  %v343_v19 = vmul.f32 0.015625, %v335_v17 }
  0xa3   : > { %v344_v20 = vmul.f32 0.015625, %v342_v18  ;;  %v345_v21 = vmul.f32 %v343_v19, %v343_v19 }
  0xa5   : > { %v346_v22 = vsub.f32 %v344_v20, %v345_v21 }
  0xa7   : > { %v347_v23 = vmax.f32 %v346_v22, 0.0 }
  0xa9   : > { %v349_v24 = vadd.f32 1e-05, %v347_v23 }
  0xab   : > { %509 = vrsqrt.f32 %v349_v24 }
  0xb5   : > { %v510_v26 = vpop.eup %509 }
  0xb6   : > { %v351_v27 = vmul.f32 %v510_v26, %v348_v25 }
  0xb8   : > { %352 = vst [vmem:[%s878_s3] sm:$0x1] %v351_v27  ;;  %v354_v29 = vmul.f32 %v351_v27, %v343_v19 }
  0xba   : > { %v355_v30 = vsub.f32 %v353_v28, %v354_v29 }
  0xbc   : > { %356 = vst [vmem:[%s879_s4] sm:$0x1] %v355_v30 }
  0xbd PF: > { %p16_p6 = scmp.ge.s32.totalorder %s690_s20, 4   ;;  %s899_s15 = smov %s627_s16 }
  0xbe   : > { %s900_s16 = smov %s631_s17  ;;  %s901_s17 = smov %s700_s23 }
  0xbf   : > { %s902_s18 = smov %s690_s20  ;;  %18 = sbr.rel (!%p16_p6) target bundleno = 4 (0x4), region = 92 }
  0xc6   :  { %374 = vsyncpa [#allocation5], 1 }
  0xc7   :  { %376 = vsyncpa [#allocation5 + $0x1], 1 }
  0xc8   :  { %377 = vsyncpa [#allocation7], 1 }

// kernel: double_norm_log.3
= control target key start
LH: loop header
LB: loop body
LE: loop exit
PB: predicated region body
PF: predicated region fallthrough
CT: control target
= control target key end

     0   :  { %13 = vsyncpa [#allocation3], 0  ;;  %s1060_s0 = inlined_call_operand.vmem [shape: f32[64,128], index: 0, kind: input, shape index: {}]   ;;  %s1061_s1 = inlined_call_operand.vmem [shape: s8[64,128], index: 1, kind: input, shape index: {}]   ;;  %s1062_s2 = inlined_call_operand.vmem [shape: f32[1,128], index: 2, kind: input, shape index: {}]   ;;  %s1063_s3 = inlined_call_operand.vmem [shape: f32[1,128], index: 3, kind: input, shape index: {}]   ;;  %s1064_s4 = inlined_call_operand.vmem [shape: f32[1,128], index: 4, kind: input, shape index: {}]   ;;  %s1065_s5 = inlined_call_operand.vmem [shape: f32[1,128], index: 5, kind: input, shape index: {}]   ;;  %s1066_s6 = inlined_call_operand.vmem [shape: f32[1,128], index: 6, kind: input, shape index: {}]   ;;  %s1067_s7 = inlined_call_operand.vmem [shape: f32[1,128], index: 7, kind: input, shape index: {}]   ;;  %s1068_s8 = inlined_call_operand.hbm [shape: f32[64,256], index: 8, kind: output, shape index: {}]  }
   0x1   :  { %15 = vsyncpa [#allocation3 + $0x1], 0  ;;  %s867_s27 = smov 0   ;;  %s869_s28 = smov 0  }
   0x2   :  { %s871_s29 = smov 0   ;;  %s873_s30 = smov 0  }
   0x3 LB: > { %s888_s9 = sadd.s32 4294967295, %s817_s30   ;;  %s672_s10 = sadd.s32 4294967294, %s817_s30   ;;  %s817_s30 = sphi %s873_s30, %s1074_s30   ;;  %s813_s29 = sphi %s871_s29, %s1073_s29   ;;  %s809_s28 = sphi %s869_s28, %s1072_s28   ;;  %s805_s27 = sphi %s867_s27, %s1071_s27  }
   0x4   : > { %s892_s11 = sadd.s32 1, %s817_s30   ;;  %s206_s12 = sadd.s32 1, %s813_s29 }
   0x5   : > { %s203_s13 = ssub.s32 %s817_s30, %s892_s11  ;;  %p216_p0 = scmp.ne.s32.totalorder %s813_s29, %s809_s28 }
   0x6   : > { %p204_p1 = scmp.eq.s32.totalorder %s203_s13, 0  ;;  %p217_p2 = scmp.eq.s32.totalorder %s888_s9, 1 }
   0x7   : > { %p222_p3 = scmp.ne.s32.totalorder %s809_s28, %s805_s27  ;;  %p223_p4 = scmp.eq.s32.totalorder %s672_s10, 1 }
   0x8   : > { %s903_s14 = scalar_select %p204_p1, %s813_s29, %s206_s12  }
   0x9   : > { %p905_p5 = por %p217_p2, %p216_p0  ;;  %p909_p6 = por %p223_p4, %p222_p3 }
   0xa   : > { %p675_p7 = scmp.ge.s32.totalorder %s817_s30, 1  ;;  %p275_p8 = scmp.lt.s32.totalorder %s817_s30, 3 }
   0xc   : > { %p276_p9 = pnand %p675_p7, %p275_p8 }
   0xd   : > { %p319_p10 = scmp.lt.s32.totalorder (!%p276_p9), %s888_s9, 1  ;;  %s677_s17 = sshll.u32 (!%p276_p9), %s888_s9, 2  ;;  %v680_v48 = vld [vmem:[%s1062_s2] ss:$0 sm:$0xff] (!%p276_p9) }
   0xe   : > { %279 = sbr.rel (%p276_p9) target bundleno = 256 (0x100), region = 52  ;;  %p314_p11 = scmp.lt.s32.totalorder (!%p276_p9), %s677_s17, 7  ;;  %v681_v55 = vld [vmem:[%s1063_s3] ss:$0 sm:$0xff] (!%p276_p9) }
   0xf   : > { %s697_s13 = sshll.u32 (!%p276_p9), %s888_s9, 10 }
  0x10   : > { %s1013_s21 = scalar_lea.hbm (!%p276_p9), %s1068_s8, %s697_s13 }
  0x15   : > { %s320_s18 = scalar_select %p319_p10, %s888_s9, 1 }
  0x16   : > { %s1076_s17 = smov (!%p314_p11, %s677_s17), 7 }
  0x17   : > { %s679_s19 = sshll.u32 %s320_s18, 3  ;;  %s678_s23 = sshll.u32 %s1076_s17, 3 }
  0x18   : > { %s322_s22 = scalar_lea.vmem %s1061_s1, %s679_s19  ;;  %s317_s26 = scalar_lea.vmem %s1060_s0, %s678_s23 }
  0x19   : > { %v430_v0 = vld [vmem:[%s322_s22] sm:$0xff]  ;;  %v924_v5 = vld [vmem:[%s317_s26 + $0x10] sm:$0xff]  ;;  %v928_v7 = vld [vmem:[%s317_s26 + $0x18] sm:$0xff]  ;;  %s310_s18 = sand.u32 1, %s809_s28  }
  0x1a   : > { %v432_v1 = vunpack.c.1.s8 %v430_v0  ;;  %v431_v2 = vunpack.c.0.s8 %v430_v0  ;;  %v434_v3 = vunpack.c.3.s8 %v430_v0  ;;  %v433_v4 = vunpack.c.2.s8 %v430_v0  ;;  %v926_v6 = vld [vmem:[%s317_s26] sm:$0xff]  ;;  %v943_v19 = vld [vmem:[%s317_s26 + $0x8] sm:$0xff]  ;;  %s676_s23 = sshll.u32 %s310_s18, 6  ;;  %s1019_s9 = scalar_lea.sflag [#allocation3], %s310_s18 }
  0x1b   : > { %v338_v8 = vand.u32 2147483647, %v924_v5  ;;  %v336_v9 = vand.u32 2147483647, %v926_v6  ;;  %v339_v12 = vand.u32 2147483647, %v928_v7 }
  0x1c   : > { %v932_v10 = vcvt.s32.f32 %v432_v1  ;;  %v934_v11 = vcvt.s32.f32 %v431_v2  ;;  %v939_v13 = vcvt.s32.f32 %v434_v3  ;;  %v941_v14 = vcvt.s32.f32 %v433_v4  ;;  %s312_s12 = scalar_lea.vmem [#allocation2], %s676_s23  ;;  %s819_s23 = smov [#allocation2]  }
  0x1d   : > { %vm346_vm0 = vcmp.lt.f32.partialorder %v338_v8, inf  ;;  %vm344_vm1 = vcmp.lt.f32.partialorder %v336_v9, inf  ;;  %vm347_vm2 = vcmp.lt.f32.partialorder %v339_v12, inf  ;;  %v337_v26 = vand.u32 2147483647, %v943_v19  ;;  %s598_s17 = sshll.u32 %s312_s12, 4  ;;  %s1015_s17 = int_to_ptr.vmem [resolvable:$true] %s598_s17 }
  0x1e   : > { %449 = vadd.xlane.f32.xlu1 %v932_v10  ;;  %447 = vadd.xlane.f32.xlu0 %v934_v11  ;;  %v350_v15 = vsel %vm346_vm0, %v338_v8, 0.0  ;;  %v348_v16 = vsel %vm344_vm1, %v336_v9, 0.0  ;;  %v472_v20 = vmul.f32 %v932_v10, %v932_v10  ;;  %v351_v21 = vsel %vm347_vm2, %v339_v12, 0.0  ;;  %s755_s22 = scalar_lea.vmem %s1015_s17, 1024  ;;  %s759_s24 = sshll.u32 %s819_s23, 4  ;;  %s760_s24 = int_to_ptr.vmem [resolvable:$false] %s759_s24 }
  0x1f   : > { %v370_v17 = vadd.f32 1.0, %v350_v15  ;;  %v352_v18 = vadd.f32 1.0, %v348_v16  ;;  %v471_v22 = vmul.f32 %v934_v11, %v934_v11  ;;  %v373_v23 = vmul.f32 -0.5, %v350_v15  ;;  %p756_p12 = scmp.ne.s32.totalorder %s1015_s17, %s755_s22  ;;  %s761_s25 = scalar_lea.vmem %s760_s24, 2048 }
  0x20   : > { %v379_v24 = vadd.f32 1.0, %v351_v21  ;;  %v355_v25 = vmul.f32 -0.5, %v348_v16  ;;  %v382_v27 = vmul.f32 -0.5, %v351_v21  ;;  %vm345_vm3 = vcmp.lt.f32.partialorder %v337_v26, inf  ;;  %p762_p1 = scmp.lt.s32.totalorder %s1015_s17, %s760_s24  ;;  %p763_p2 = scmp.lt.s32.totalorder %s761_s25, %s755_s22 }
  0x21   : > { %739 = vlog2.f32 %v370_v17  ;;  %v374_v28 = vadd.f32 1.0, %v373_v23  ;;  %v349_v29 = vsel %vm345_vm3, %v337_v26, 0.0  ;;  %v376_v30 = vand.u32 2147483647, %v350_v15  ;;  %p757_p13 = pnand %p756_p12, %p905_p5 }
  0x22   : > { %453 = vadd.xlane.f32.xlu1 %v939_v13  ;;  %451 = vadd.xlane.f32.xlu0 %v941_v14  ;;  %741 = vlog2.f32 %v352_v18  ;;  %v356_v31 = vadd.f32 1.0, %v355_v25  ;;  %v361_v32 = vadd.f32 1.0, %v349_v29  ;;  %v358_v33 = vand.u32 2147483647, %v348_v16  ;;  %p764_p3 = por %p763_p2, %p762_p1 }
  0x23   : > { %743 = vlog2.f32 %v379_v24  ;;  %v383_v34 = vadd.f32 1.0, %v382_v27  ;;  %v375_v35 = vmul.f32 %v374_v28, %v350_v15  ;;  %v385_v36 = vand.u32 2147483647, %v351_v21  ;;  %p758_p0 = pneg %p757_p13 }
  0x24   : > { %745 = vlog2.f32 %v361_v32  ;;  %v364_v37 = vmul.f32 -0.5, %v349_v29  ;;  %v334_v39 = vand.u32 2147483648, %v924_v5  ;;  %vm377_vm4 = vcmp.lt.f32.partialorder %v376_v30, 0.0004427343 }
  0x25   : > { %v357_v40 = vmul.f32 %v356_v31, %v348_v16  ;;  %v332_v43 = vand.u32 2147483648, %v926_v6  ;;  %vm359_vm5 = vcmp.lt.f32.partialorder %v358_v33, 0.0004427343  ;;  %v384_v45 = vmul.f32 %v383_v34, %v351_v21  ;;  %p765_p4 = pnand %p764_p3, %p758_p0 }
  0x26   : > { %477 = vadd.xlane.f32.xlu1 %v472_v20  ;;  %475 = vadd.xlane.f32.xlu0 %v471_v22  ;;  %v335_v49 = vand.u32 2147483648, %v928_v7  ;;  %vm386_vm6 = vcmp.lt.f32.partialorder %v385_v36, 0.0004427343  ;;  %v365_v50 = vadd.f32 1.0, %v364_v37  ;;  %v367_v54 = vand.u32 2147483647, %v349_v29 }
  0x27   : > { %v333_v0 = vand.u32 2147483648, %v943_v19  ;;  %v474_v21 = vmul.f32 %v939_v13, %v939_v13  ;;  %v473_v22 = vmul.f32 %v941_v14, %v941_v14 }
  0x28   : > { %v366_v61 = vmul.f32 %v365_v50, %v349_v29  ;;  %vm368_vm7 = vcmp.lt.f32.partialorder %v367_v54, 0.0004427343 }
  0x2b   : > { %v740_v38 = vpop.eup %739 }
  0x2c   : > { %v742_v41 = vpop.eup %741  ;;  %v372_v42 = vmul.f32 0.6931472, %v740_v38 }
  0x2d   : > { %v354_v44 = vmul.f32 0.6931472, %v742_v41  ;;  %v744_v46 = vpop.eup %743 }
  0x2e   : > { %v378_v47 = vsel %vm377_vm4, %v375_v35, %v372_v42  ;;  %v381_v53 = vmul.f32 0.6931472, %v744_v46  ;;  %v746_v62 = vpop.eup %745 }
  0x2f   : > { %v394_v51 = vor.u32 %v378_v47, %v334_v39  ;;  %v360_v52 = vsel %vm359_vm5, %v357_v40, %v354_v44  ;;  %v363_v3 = vmul.f32 0.6931472, %v746_v62 }
  0x30   : > { %v392_v56 = vor.u32 %v360_v52, %v332_v43  ;;  %v387_v58 = vsel %vm386_vm6, %v384_v45, %v381_v53 }
  0x31   : > { %v409_v57 = vmul.f32 %v680_v48, %v394_v51  ;;  %v395_v60 = vor.u32 %v387_v58, %v335_v49  ;;  %v369_v7 = vsel %vm368_vm7, %v366_v61, %v363_v3 }
  0x32   : > { %v407_v59 = vmul.f32 %v680_v48, %v392_v56  ;;  %v393_v8 = vor.u32 %v369_v7, %v333_v0 }
  0x33   : > { %v420_v63 = vadd.f32 %v681_v55, %v409_v57  ;;  %v410_v2 = vmul.f32 %v680_v48, %v395_v60 }
  0x34   : > { %v418_v1 = vadd.f32 %v681_v55, %v407_v59  ;;  %v408_v12 = vmul.f32 %v680_v48, %v393_v8 }
  0x35   : > { %v962_v4 = vclamps-f32 %v420_v63, 3.0  ;;  %v421_v6 = vadd.f32 %v681_v55, %v410_v2 }
  0x36   : > { %v964_v5 = vclamps-f32 %v418_v1, 3.0  ;;  %v419_v15 = vadd.f32 %v681_v55, %v408_v12 }
  0x37   : > { %443 = vadd.xlane.f32.xlu1 %v962_v4  ;;  %v968_v9 = vclamps-f32 %v421_v6, 3.0  ;;  %v461_v20 = vmul.f32 %v962_v4, %v962_v4 }
  0x38   : > { %439 = vadd.xlane.f32.xlu0 %v964_v5  ;;  %v971_v16 = vclamps-f32 %v419_v15, 3.0  ;;  %v459_v18 = vmul.f32 %v964_v5, %v964_v5 }
  0x39   : > { %v462_v19 = vmul.f32 %v968_v9, %v968_v9 }
  0x3a   : > { %v460_v17 = vmul.f32 %v971_v16, %v971_v16 }
  0x3b   : > { %445 = vadd.xlane.f32.xlu1 %v968_v9 }
  0x3c   : > { %441 = vadd.xlane.f32.xlu0 %v971_v16 }
  0x3f   : > { %465 = vadd.xlane.f32.xlu1 %v460_v17 }
  0x40   : > { %463 = vadd.xlane.f32.xlu0 %v459_v18  ;;  %v686_v18 = vld [vmem:[%s1064_s4] ss:$0 sm:$0xff] }
  0x43   : > { %469 = vadd.xlane.f32.xlu1 %v462_v19  ;;  %v688_v19 = vld [vmem:[%s1065_s5] ss:$0 sm:$0xff] }
  0x44   : > { %467 = vadd.xlane.f32.xlu0 %v461_v20 }
  0x47   : > { %481 = vadd.xlane.f32.xlu1 %v474_v21 }
  0x48   : > { %479 = vadd.xlane.f32.xlu0 %v473_v22 }
  0xab   : > { %v450_v23 = vpop.xlane.xlu1 %449  ;;  %v448_v24 = vpop.xlane.xlu0 %447 }
  0xaf   : > { %v454_v25 = vpop.xlane.xlu1 %453  ;;  %v452_v26 = vpop.xlane.xlu0 %451 }
  0xb3   : > { %v478_v27 = vpop.xlane.xlu1 %477  ;;  %v476_v28 = vpop.xlane.xlu0 %475 }
  0xc4   : > { %v444_v29 = vpop.xlane.xlu1 %443 }
  0xc5   : > { %v440_v30 = vpop.xlane.xlu0 %439  ;;  %v457_v45 = vadd.f32 %v452_v26, %v444_v29 }
  0xc6   : > { %v455_v32 = vadd.f32 %v448_v24, %v440_v30 }
  0xc7   : > { %v489_v54 = vmul.f32 0.00390625, %v457_v45 }
  0xc8   : > { %v446_v31 = vpop.xlane.xlu1 %445  ;;  %v487_v38 = vmul.f32 0.00390625, %v455_v32 }
  0xc9   : > { %v442_v33 = vpop.xlane.xlu0 %441  ;;  %v458_v40 = vadd.f32 %v454_v25, %v446_v31  ;;  %v497_v0 = vmul.f32 %v489_v54, %v489_v54 }
  0xca   : > { %v456_v34 = vadd.f32 %v450_v23, %v442_v33  ;;  %v495_v47 = vmul.f32 %v487_v38, %v487_v38  ;;  %v515_v22 = vsub.f32 %v964_v5, %v487_v38  ;;  %v689_v23 = vld [vmem:[%s1067_s7] ss:$0 sm:$0xff] }
  0xcb   : > { %v490_v50 = vmul.f32 0.00390625, %v458_v40 }
  0xcc   : > { %v466_v35 = vpop.xlane.xlu1 %465  ;;  %v488_v36 = vmul.f32 0.00390625, %v456_v34 }
  0xcd   : > { %v484_v37 = vadd.f32 %v478_v27, %v466_v35  ;;  %v464_v39 = vpop.xlane.xlu0 %463  ;;  %v498_v59 = vmul.f32 %v490_v50, %v490_v50  ;;  %v518_v5 = vsub.f32 %v968_v9, %v490_v50 }
  0xce   : > { %v496_v42 = vmul.f32 %v488_v36, %v488_v36  ;;  %v483_v43 = vadd.f32 %v476_v28, %v464_v39  ;;  %v516_v12 = vsub.f32 %v971_v16, %v488_v36  ;;  %v550_v15 = vsub.f32 %v932_v10, %v488_v36  ;;  %v687_v10 = vld [vmem:[%s1066_s6] ss:$0 sm:$0xff] }
  0xcf   : > { %v492_v41 = vmul.f32 0.00390625, %v484_v37  ;;  %v549_v16 = vsub.f32 %v934_v11, %v487_v38  ;;  %v552_v11 = vsub.f32 %v939_v13, %v490_v50  ;;  %v517_v36 = vsub.f32 %v962_v4, %v489_v54 }
  0xd0   : > { %v470_v44 = vpop.xlane.xlu1 %469  ;;  %v491_v48 = vmul.f32 0.00390625, %v483_v43  ;;  %v551_v37 = vsub.f32 %v941_v14, %v489_v54 }
  0xd1   : > { %v500_v46 = vsub.f32 %v492_v41, %v496_v42  ;;  %v468_v49 = vpop.xlane.xlu0 %467 }
  0xd2   : > { %v499_v52 = vsub.f32 %v491_v48, %v495_v47 }
  0xd3   : > { %v504_v51 = vmax.f32 %v500_v46, 0.0 }
  0xd4   : > { %v482_v53 = vpop.xlane.xlu1 %481  ;;  %v503_v57 = vmax.f32 %v499_v52, 0.0 }
  0xd5   : > { %v508_v55 = vadd.f32 1e-05, %v504_v51  ;;  %v486_v56 = vadd.f32 %v482_v53, %v470_v44  ;;  %v480_v58 = vpop.xlane.xlu0 %479 }
  0xd6   : > { %v485_v61 = vadd.f32 %v480_v58, %v468_v49  ;;  %v507_v62 = vadd.f32 1e-05, %v503_v57 }
  0xd7   : > { %747 = vrsqrt.f32 %v508_v55  ;;  %v494_v60 = vmul.f32 0.00390625, %v486_v56 }
  0xd8   : > { %v493_v1 = vmul.f32 0.00390625, %v485_v61  ;;  %749 = vrsqrt.f32 %v507_v62 }
  0xd9   : > { %v502_v63 = vsub.f32 %v494_v60, %v498_v59 }
  0xda   : > { %v501_v3 = vsub.f32 %v493_v1, %v497_v0 }
  0xdb   : > { %v506_v2 = vmax.f32 %v502_v63, 0.0 }
  0xdc   : > { %v505_v7 = vmax.f32 %v501_v3, 0.0 }
  0xdd   : > { %v510_v6 = vadd.f32 1e-05, %v506_v2 }
  0xde   : > { %v509_v8 = vadd.f32 1e-05, %v505_v7 }
  0xdf   : > { %751 = vrsqrt.f32 %v510_v6 }
  0xe0   : > { %753 = vrsqrt.f32 %v509_v8 }
  0xe1   : > { %v748_v17 = vpop.eup %747 }
  0xe2   : > { %v520_v20 = vmul.f32 %v748_v17, %v516_v12  ;;  %v554_v21 = vmul.f32 %v748_v17, %v550_v15  ;;  %v750_v24 = vpop.eup %749 }
  0xe3   : > { %v519_v27 = vmul.f32 %v750_v24, %v515_v22  ;;  %v553_v28 = vmul.f32 %v750_v24, %v549_v16 }
  0xe4   : > { %v531_v25 = vmul.f32 %v686_v18, %v520_v20  ;;  %v565_v26 = vmul.f32 %v688_v19, %v554_v21 }
  0xe5   : > { %v530_v31 = vmul.f32 %v686_v18, %v519_v27  ;;  %v564_v32 = vmul.f32 %v688_v19, %v553_v28 }
  0xe6   : > { %v542_v29 = vadd.f32 %v687_v10, %v531_v25  ;;  %v576_v30 = vadd.f32 %v689_v23, %v565_v26 }
  0xe7   : > { %v541_v34 = vadd.f32 %v687_v10, %v530_v31  ;;  %v575_v35 = vadd.f32 %v689_v23, %v564_v32 }
  0xe8   : > { %546 = vst [vmem:[%s312_s12 + $0x10] sm:$0xff] %v542_v29  ;;  %580 = vst [vmem:[%s312_s12 + $0x18] sm:$0xff] %v576_v30 }
  0xe9   : > { %v752_v33 = vpop.eup %751  ;;  %545 = vst [vmem:[%s312_s12] sm:$0xff] %v541_v34  ;;  %579 = vst [vmem:[%s312_s12 + $0x8] sm:$0xff] %v575_v35 }
  0xea   : > { %v522_v38 = vmul.f32 %v752_v33, %v518_v5  ;;  %v556_v39 = vmul.f32 %v752_v33, %v552_v11  ;;  %v754_v40 = vpop.eup %753 }
  0xeb   : > { %v521_v42 = vmul.f32 %v754_v40, %v517_v36  ;;  %v555_v13 = vmul.f32 %v754_v40, %v551_v37 }
  0xec   : > { %v533_v41 = vmul.f32 %v686_v18, %v522_v38  ;;  %v567_v9 = vmul.f32 %v688_v19, %v556_v39 }
  0xed   : > { %v532_v45 = vmul.f32 %v686_v18, %v521_v42  ;;  %v566_v46 = vmul.f32 %v688_v19, %v555_v13 }
  0xee   : > { %v544_v43 = vadd.f32 %v687_v10, %v533_v41  ;;  %v578_v44 = vadd.f32 %v689_v23, %v567_v9 }
  0xef   : > { %v543_v14 = vadd.f32 %v687_v10, %v532_v45  ;;  %v577_v4 = vadd.f32 %v689_v23, %v566_v46 }
  0xf0   : > { %548 = vst [vmem:[%s312_s12 + $0x30] sm:$0xff] %v544_v43  ;;  %582 = vst [vmem:[%s312_s12 + $0x38] sm:$0xff] %v578_v44 }
  0xf1   : > { %547 = vst [vmem:[%s312_s12 + $0x20] sm:$0xff] %v543_v14  ;;  %581 = vst [vmem:[%s312_s12 + $0x28] sm:$0xff] %v577_v4 }
  0xf2   : > { %768 = shalt.err (!%p765_p4)
}
  0xf3   : > { %s769_s18 = scalar_lea.hbm %s1013_s21, 1024  ;;  %s773_s12 = scalar_lea.hbm %s1068_s8, 2048 }
  0xf4   : > { %p770_p7 = scmp.ne.s32.totalorder %s1013_s21, %s769_s18  ;;  %p774_p10 = scmp.lt.u32.totalorder %s1013_s21, %s1068_s8 }
  0xf5   : > { %p775_p11 = scmp.lt.u32.totalorder %s773_s12, %s769_s18  ;;  %p777_p13 = scmp.lt.u32.totalorder %s769_s18, %s1013_s21 }
  0xf6   : > { %p771_p8 = pnand %p770_p7, %p905_p5 }
  0xf7   : > { %p776_p12 = por %p775_p11, %p774_p10 }
  0xf8   : > { %p772_p9 = pneg %p771_p8 }
  0xf9   : > { %p778_p0 = por %p777_p13, %p776_p12 }
  0xfb   : > { %p779_p1 = pnand %p778_p0, %p772_p9 }
  0xfd   : > { %782 = shalt.err (!%p779_p1)
}
  0xfe   : > { %s820_s20 = smov 256   ;;  %s821_s22 = smov 16  }
  0xff   : > { %698 = dma.vmem_to_hbm [thread:$0]  (%p905_p5), %s1015_s17, 1024, %s1013_s21, %s1019_s9, %s820_s20, %s820_s20, %s821_s22  }
 0x100 PF: > { %p704_p2 = scmp.ge.s32.totalorder %s817_s30, 2  ;;  %s613_s23 = sand.u32 1, %s805_s27  }
 0x101   : > { %s614_s24 = scalar_lea.sflag [#allocation3], %s613_s23 }
 0x102   : > { %p701_p3 = pnand %p704_p2, %p909_p6 }
 0x104   : > { %800 = dma.done.wait (!%p701_p3), %s614_s24, 1024  }
 0x105   : > { %802 = vsyncadd (!%p701_p3), %s614_s24, 4294966272  ;;  %p18_p4 = scmp.ge.s32.totalorder %s892_s11, 4   ;;  %s1071_s27 = smov %s809_s28 }
 0x106   : > { %s1072_s28 = smov %s813_s29  ;;  %s1073_s29 = smov %s903_s14 }
 0x107   : > { %s1074_s30 = smov %s892_s11  ;;  %20 = sbr.rel (!%p18_p4) target bundleno = 3 (0x3), region = 90 }
 0x10e   :  { %619 = vsyncpa [#allocation3], 1 }
 0x10f   :  { %621 = vsyncpa [#allocation3 + $0x1], 1 }

</bundles_post_ra>
